<compile_context>
chip_gen: v7x
topology: tpu7x:2x2x1
jax: 0.10.0
libtpu: 0.0.40
codegen_flags: <defaults>
</compile_context>

<pallas_src>
import math

import jax
import jax.numpy as jnp
from jax.experimental import pallas as pl
from jax.experimental.pallas import tpu as pltpu

# ---- Model configuration (small, lane-dense feature dim) ---------------------
D_MODEL = 128          # LayerNorm `size` (128 lanes → unmasked vector stores)
N_BATCH = 2
N_SPACE = 4
N_TIME = 8
LN_EPS = 1e-5          # torch.nn.LayerNorm default
MAX_ROW_BLOCK = 512    # cap rows per grid step (VMEM-safe on v7x's 64 MiB too)


def sublayer_connection_kernel(x_ref, w_ref, p_ref, out_ref):
    """One row-block: out = LayerNorm(x + dropout(Linear(x))), dropout=identity.

    x_ref : (R_blk, D) f32     w_ref : (D, D) bf16, (in, out) layout
    p_ref : (8, D)   f32       rows: 0=b, 1=gamma, 2=beta, 3..7 padding
    """
    x = x_ref[...]                                     # (R_blk, D) f32
    d = x.shape[-1]

    # Example sublayer: position-wise Linear — bf16 MXU inputs, f32 accumulate.
    y = jnp.dot(x.astype(jnp.bfloat16), w_ref[...],
                preferred_element_type=jnp.float32)
    y = y + p_ref[0:1, :]                              # + bias (f32)

    # TODO(synk): dropout on the sublayer output is identity here (eval mode);
    # training-mode dropout would use pltpu.prng_seed / prng_random_bits.
    z = x + y                                          # residual add (f32)

    # LayerNorm over the feature (lane) axis — single pass, independent
    # reductions (sum and sum-of-squares can issue to the XLU back-to-back).
    inv_d = 1.0 / d
    s1 = jnp.sum(z, axis=-1, keepdims=True)
    s2 = jnp.sum(z * z, axis=-1, keepdims=True)
    mean = s1 * inv_d
    var = jnp.maximum(s2 * inv_d - mean * mean, 0.0)   # guard cancellation
    inv_std = jax.lax.rsqrt(var + LN_EPS)              # EUP, frees VALU slot

    out = (z - mean) * inv_std * p_ref[1:2, :] + p_ref[2:3, :]
    out_ref[...] = out.astype(out_ref.dtype)


def sublayer_connection(x, params):
    """Pallas-backed forward pass. x: (N, S, T, D) float32."""
    N, S, T, D = x.shape
    R = N * S * T                                       # 64 rows at toy size

    x2 = x.reshape(R, D)                                # lane-dense slab
    w_bf16 = params["w_io"].astype(jnp.bfloat16)        # (in, out), bf16 DMA

    # Pack b / gamma / beta into one sublane-padded (8, D) operand → single DMA.
    pbuf = jnp.zeros((8, D), jnp.float32)
    pbuf = pbuf.at[0].set(params["b"])
    pbuf = pbuf.at[1].set(params["gamma"])
    pbuf = pbuf.at[2].set(params["beta"])

    # Row tiling: one step at toy size; multiple parallel blocks at scale
    # (keeps 2× (R_blk×D) + W well under even v7x's 32 MiB scoped VMEM).
    row_block = R if R <= MAX_ROW_BLOCK else MAX_ROW_BLOCK
    grid = (pl.cdiv(R, row_block),)

    cost = pl.CostEstimate(
        flops=2 * R * D * D,
        transcendentals=R,                              # one rsqrt per row
        bytes_accessed=R * D * 4 + D * D * 2 + 8 * D * 4 + R * D * 4,
    )

    out = pl.pallas_call(
        sublayer_connection_kernel,
        out_shape=jax.ShapeDtypeStruct((R, D), x.dtype),
        grid_spec=pltpu.PrefetchScalarGridSpec(
            num_scalar_prefetch=0,
            grid=grid,
            in_specs=[
                pl.BlockSpec((row_block, D), lambda i: (i, 0)),   # x (tiled rows)
                pl.BlockSpec((D, D), lambda i: (0, 0)),           # W resident
                pl.BlockSpec((8, D), lambda i: (0, 0)),           # b/gamma/beta
            ],
            out_specs=pl.BlockSpec((row_block, D), lambda i: (i, 0)),
        ),
        compiler_params=pltpu.CompilerParams(
            dimension_semantics=("parallel",)),
        cost_estimate=cost,
    )(x2, w_bf16, pbuf)

    return out.reshape(N, S, T, D)


# ---- Pure-JAX reference (mirrors the PyTorch module; matmul numerics match the
# kernel's bf16-input / f32-accumulate MXU path) --------------------------------
def reference(x, params):
    w_bf16 = params["w_io"].astype(jnp.bfloat16)
    y = jnp.dot(x.astype(jnp.bfloat16), w_bf16,
                preferred_element_type=jnp.float32) + params["b"]
    z = x + y                                           # dropout identity (eval)
    mean = jnp.mean(z, axis=-1, keepdims=True)
    var = jnp.mean((z - mean) ** 2, axis=-1, keepdims=True)
    return (z - mean) / jnp.sqrt(var + LN_EPS) * params["gamma"] + params["beta"]


def make_params(key):
    kw, kb, kg, kbeta = jax.random.split(key, 4)
    scale = 1.0 / math.sqrt(D_MODEL)
    return {
        # Pre-stored in (in, out) layout = nn.Linear.weight.T — avoids a hidden
        # per-call transpose before the pallas_call.
        "w_io": jax.random.uniform(kw, (D_MODEL, D_MODEL), jnp.float32,
                                   -scale, scale),
        "b": jax.random.uniform(kb, (D_MODEL,), jnp.float32, -scale, scale),
        # nn.LayerNorm defaults to gamma=1, beta=0; random affine gives a
        # stronger correctness check (same semantics).
        "gamma": 1.0 + 0.1 * jax.random.normal(kg, (D_MODEL,), jnp.float32),
        "beta": 0.1 * jax.random.normal(kbeta, (D_MODEL,), jnp.float32),
    }


if __name__ == "__main__":
    root = jax.random.PRNGKey(0)
    k_params, kx = jax.random.split(root, 2)

    params = make_params(k_params)
    x = jax.random.normal(kx, (N_BATCH, N_SPACE, N_TIME, D_MODEL), jnp.float32)

    out = sublayer_connection(x, params)
    out = jax.block_until_ready(out)

    ref = reference(x, params)
    assert out.shape == (N_BATCH, N_SPACE, N_TIME, D_MODEL)
    assert jnp.allclose(out, ref, rtol=1e-4, atol=1e-4), (
        f"max abs err = {jnp.max(jnp.abs(out - ref))}")

    print("KERNEL_OK")
</pallas_src>

<mosaic_0001>
module attributes {stable_mosaic.version = 11 : i64} {
  func.func @sublayer_connection_kernel(%arg0: i32, %arg1: memref<64x128xf32, #tpu.memory_space<vmem>>, %arg2: memref<128x128xbf16, #tpu.memory_space<vmem>>, %arg3: memref<8x128xf32, #tpu.memory_space<vmem>>, %arg4: memref<64x128xf32, #tpu.memory_space<vmem>>) attributes {dimension_semantics = [#tpu.dimension_semantics<parallel>], iteration_bounds = array<i64: 1>, scalar_prefetch = 0 : i64, scratch_operands = 0 : i64, tpu.core_type = #tpu.core_type<tc>, window_params = [{transform_indices = @transform_0, window_bounds = array<i64: 64, 128>}, {pipeline_mode = #tpu.pipeline_mode<synchronous>, transform_indices = @transform_1, window_bounds = array<i64: 128, 128>}, {pipeline_mode = #tpu.pipeline_mode<synchronous>, transform_indices = @transform_2, window_bounds = array<i64: 8, 128>}, {transform_indices = @transform_3, window_bounds = array<i64: 64, 128>}]} {
    %c0 = arith.constant 0 : index
    %c0_0 = arith.constant 0 : index
    %0 = vector.load %arg1[%c0, %c0_0] : memref<64x128xf32, #tpu.memory_space<vmem>>, vector<64x128xf32>
    %1 = arith.truncf %0 : vector<64x128xf32> to vector<64x128xbf16>
    %c0_1 = arith.constant 0 : index
    %c0_2 = arith.constant 0 : index
    %2 = vector.load %arg2[%c0_1, %c0_2] : memref<128x128xbf16, #tpu.memory_space<vmem>>, vector<128x128xbf16>
    %cst = arith.constant dense<0.000000e+00> : vector<64x128xf32>
    %3 = tpu.matmul %1, %2, %cst {dimension_numbers = #tpu.dot_dimension_numbers<[1], [0], [0], [1], [0, 0, 1, 1], [], []>} : vector<64x128xbf16>, vector<128x128xbf16>, vector<64x128xf32> -> vector<64x128xf32>
    %c0_3 = arith.constant 0 : index
    %c0_4 = arith.constant 0 : index
    %4 = vector.load %arg3[%c0_3, %c0_4] : memref<8x128xf32, #tpu.memory_space<vmem>>, vector<1x128xf32>
    %5 = vector.broadcast %4 : vector<1x128xf32> to vector<64x128xf32>
    %6 = arith.addf %3, %5 : vector<64x128xf32>
    %7 = arith.addf %0, %6 : vector<64x128xf32>
    %cst_5 = arith.constant dense<0.000000e+00> : vector<64xf32>
    %8 = vector.multi_reduction <add>, %7, %cst_5 [1] : vector<64x128xf32> to vector<64xf32>
    %9 = vector.shape_cast %8 : vector<64xf32> to vector<64x1xf32>
    %10 = arith.mulf %7, %7 : vector<64x128xf32>
    %cst_6 = arith.constant dense<0.000000e+00> : vector<64xf32>
    %11 = vector.multi_reduction <add>, %10, %cst_6 [1] : vector<64x128xf32> to vector<64xf32>
    %12 = vector.shape_cast %11 : vector<64xf32> to vector<64x1xf32>
    %cst_7 = arith.constant 7.812500e-03 : f32
    %13 = vector.broadcast %cst_7 : f32 to vector<64x1xf32>
    %14 = arith.mulf %9, %13 : vector<64x1xf32>
    %cst_8 = arith.constant 7.812500e-03 : f32
    %15 = vector.broadcast %cst_8 : f32 to vector<64x1xf32>
    %16 = arith.mulf %12, %15 : vector<64x1xf32>
    %17 = arith.mulf %14, %14 : vector<64x1xf32>
    %18 = arith.subf %16, %17 : vector<64x1xf32>
    %cst_9 = arith.constant 0.000000e+00 : f32
    %19 = vector.broadcast %cst_9 : f32 to vector<64x1xf32>
    %20 = arith.maximumf %18, %19 : vector<64x1xf32>
    %cst_10 = arith.constant 9.99999974E-6 : f32
    %21 = vector.broadcast %cst_10 : f32 to vector<64x1xf32>
    %22 = arith.addf %20, %21 : vector<64x1xf32>
    %23 = math.rsqrt %22 : vector<64x1xf32>
    %24 = vector.broadcast %14 : vector<64x1xf32> to vector<64x128xf32>
    %25 = arith.subf %7, %24 : vector<64x128xf32>
    %26 = vector.broadcast %23 : vector<64x1xf32> to vector<64x128xf32>
    %27 = arith.mulf %25, %26 : vector<64x128xf32>
    %c1 = arith.constant 1 : index
    %c0_11 = arith.constant 0 : index
    %28 = vector.load %arg3[%c1, %c0_11] : memref<8x128xf32, #tpu.memory_space<vmem>>, vector<1x128xf32>
    %29 = vector.broadcast %28 : vector<1x128xf32> to vector<64x128xf32>
    %30 = arith.mulf %27, %29 : vector<64x128xf32>
    %c2 = arith.constant 2 : index
    %c0_12 = arith.constant 0 : index
    %31 = vector.load %arg3[%c2, %c0_12] : memref<8x128xf32, #tpu.memory_space<vmem>>, vector<1x128xf32>
    %32 = vector.broadcast %31 : vector<1x128xf32> to vector<64x128xf32>
    %33 = arith.addf %30, %32 : vector<64x128xf32>
    %c0_13 = arith.constant 0 : index
    %c0_14 = arith.constant 0 : index
    %34 = vector.load %arg4[%c0_13, %c0_14] : memref<64x128xf32, #tpu.memory_space<vmem>>, vector<64x128xf32>
    tpu.vector_store %arg4[%c0_13, %c0_14], %33 {strides = array<i32>} : memref<64x128xf32, #tpu.memory_space<vmem>>, vector<64x128xf32>,
    return
  }
  func.func @transform_0(%arg0: i32) -> (i32, i32) {
    %c0_i32 = arith.constant 0 : i32
    %c0_i32_0 = arith.constant 0 : i32
    return %arg0, %c0_i32 : i32, i32
  }
  func.func @transform_1(%arg0: i32) -> (i32, i32) {
    %c0_i32 = arith.constant 0 : i32
    %c0_i32_0 = arith.constant 0 : i32
    %c0_i32_1 = arith.constant 0 : i32
    return %c0_i32, %c0_i32_0 : i32, i32
  }
  func.func @transform_2(%arg0: i32) -> (i32, i32) {
    %c0_i32 = arith.constant 0 : i32
    %c0_i32_0 = arith.constant 0 : i32
    %c0_i32_1 = arith.constant 0 : i32
    return %c0_i32, %c0_i32_0 : i32, i32
  }
  func.func @transform_3(%arg0: i32) -> (i32, i32) {
    %c0_i32 = arith.constant 0 : i32
    %c0_i32_0 = arith.constant 0 : i32
    return %arg0, %c0_i32 : i32, i32
  }
}

</mosaic_0001>

<bundles_post_ra>
// kernel: tpu_custom_call.1
= control target key start
LH: loop header
LB: loop body
LE: loop exit
PB: predicated region body
PF: predicated region fallthrough
CT: control target
= control target key end

     0   :  { %8 = vsyncpa [#allocation3], 0  ;;  %s739_s0 = inlined_call_operand.hbm [shape: f32[64,128], index: 0, kind: input, shape index: {}]   ;;  %s740_s1 = inlined_call_operand.hbm [shape: bf16[128,128], index: 1, kind: input, shape index: {}]   ;;  %s741_s2 = inlined_call_operand.hbm [shape: f32[8,128], index: 2, kind: input, shape index: {}]   ;;  %s742_s3 = inlined_call_operand.hbm [shape: f32[64,128], index: 3, kind: output, shape index: {}]  }
   0x1   :  { %9 = vsyncpa [#allocation6], 0 }
   0x2   :  { %10 = vsyncpa [#allocation4], 0  ;;  %s562_s12 = smov [#allocation5]   ;;  %s468_s16 = scalar_lea.hbm %s740_s1, 1024 }
   0x3   :  { %s28_s13 = sshll.u32 %s562_s12, 4  ;;  %p469_p0 = scmp.ne.s32.totalorder %s740_s1, %s468_s16  ;;  %s29_s13 = int_to_ptr.vmem [resolvable:$true] %s28_s13 }
   0x4   :  { %p472_p1 = scmp.lt.u32.totalorder %s468_s16, %s740_s1 }
   0x6   :  { %p474_p2 = pnand %p472_p1, %p469_p0 }
   0x8   :  { %477 = shalt.err (!%p474_p2)
}
   0x9   :  { %s478_s21 = scalar_lea.vmem %s29_s13, 1024  ;;  %p483_p4 = scmp.lt.s32.totalorder %s29_s13, %s29_s13 }
   0xa   :  { %p479_p3 = scmp.ne.s32.totalorder %s29_s13, %s478_s21  ;;  %p484_p5 = scmp.lt.s32.totalorder %s478_s21, %s478_s21 }
   0xc   :  { %p485_p6 = por %p484_p5, %p483_p4 }
   0xe   :  { %p486_p7 = pnand %p485_p6, %p479_p3 }
  0x10   :  { %489 = shalt.err (!%p486_p7)
}
  0x11   :  { %s563_s22 = smov 64   ;;  %s564_s23 = smov 4  }
  0x12   :  { %34 = dma.hbm_to_vmem [thread:$0]  %s740_s1, 1024, %s29_s13, [#allocation6], %s563_s22, %s563_s22, %s564_s23  }
  0x13   :  { %s565_s26 = smov [#allocation2]   ;;  %s490_s30 = scalar_lea.hbm %s739_s0, 1024 }
  0x14   :  { %s16_s27 = sshll.u32 %s565_s26, 4  ;;  %p491_p8 = scmp.ne.s32.totalorder %s739_s0, %s490_s30  ;;  %s17_s27 = int_to_ptr.vmem [resolvable:$true] %s16_s27 }
  0x15   :  { %p494_p9 = scmp.lt.u32.totalorder %s490_s30, %s739_s0 }
  0x17   :  { %p496_p10 = pnand %p494_p9, %p491_p8 }
  0x19   :  { %499 = shalt.err (!%p496_p10)
}
  0x1a   :  { %s500_s8 = scalar_lea.vmem %s17_s27, 1024  ;;  %p505_p12 = scmp.lt.s32.totalorder %s17_s27, %s17_s27 }
  0x1b   :  { %p501_p11 = scmp.ne.s32.totalorder %s17_s27, %s500_s8  ;;  %p506_p13 = scmp.lt.s32.totalorder %s500_s8, %s500_s8 }
  0x1d   :  { %p507_p0 = por %p506_p13, %p505_p12 }
  0x1f   :  { %p508_p1 = pnand %p507_p0, %p501_p11 }
  0x21   :  { %511 = shalt.err (!%p508_p1)
}
  0x22   :  { %s566_s1 = smov 128   ;;  %s567_s9 = smov 8  }
  0x23   :  { %22 = dma.hbm_to_vmem [thread:$0]  %s739_s0, 1024, %s17_s27, [#allocation3], %s566_s1, %s566_s1, %s567_s9  }
  0x24   :  { %s568_s12 = smov [#allocation7]   ;;  %s512_s16 = scalar_lea.hbm %s741_s2, 128 }
  0x25   :  { %s41_s13 = sshll.u32 %s568_s12, 4  ;;  %p513_p2 = scmp.ne.s32.totalorder %s741_s2, %s512_s16  ;;  %s42_s13 = int_to_ptr.vmem [resolvable:$true] %s41_s13 }
  0x26   :  { %p516_p3 = scmp.lt.u32.totalorder %s512_s16, %s741_s2 }
  0x28   :  { %p518_p4 = pnand %p516_p3, %p513_p2 }
  0x2a   :  { %521 = shalt.err (!%p518_p4)
}
  0x2b   :  { %s522_s21 = scalar_lea.vmem %s42_s13, 128  ;;  %p527_p6 = scmp.lt.s32.totalorder %s42_s13, %s42_s13 }
  0x2c   :  { %p523_p5 = scmp.ne.s32.totalorder %s42_s13, %s522_s21  ;;  %p528_p7 = scmp.lt.s32.totalorder %s522_s21, %s522_s21 }
  0x2e   :  { %p529_p8 = por %p528_p7, %p527_p6 }
  0x30   :  { %p530_p9 = pnand %p529_p8, %p523_p5 }
  0x32   :  { %533 = shalt.err (!%p530_p9)
}
  0x33   :  { %44 = dma.hbm_to_vmem [thread:$0]  %s741_s2, 128, %s42_s13, [#allocation6]  }
  0x34   :  { %556 = dma.done.wait [#allocation3], 1024  }
  0x35   :  { %557 = vsyncadd [#allocation3], 4294966272 }
  0x36   :  { %558 = dma.done.wait [#allocation6], 1152  }
  0x37   :  { %559 = vsyncadd [#allocation6], 4294966144  ;;  %v444_v0 = vld [vmem:[#allocation5] sm:$0xff]   ;;  %v445_v1 = vld [vmem:[#allocation5 + $0x8] sm:$0xff]   ;;  %s569_s2 = smov [#allocation8]  }
  0x38   :  { %396 = vmatprep.subr.bf16.mxu0 %v444_v0  ;;  %420 = vmatprep.subr.bf16.mxu1 %v444_v0  ;;  %v446_v2 = vld [vmem:[#allocation5 + $0x10] sm:$0xff]   ;;  %v447_v3 = vld [vmem:[#allocation5 + $0x18] sm:$0xff]   ;;  %v55_v4 = vld [vmem:[#allocation2] sm:$0xff]  ;;  %s360_s23 = sshll.u32 %s569_s2, 4  ;;  %s361_s23 = int_to_ptr.vmem [resolvable:$true] %s360_s23 }
  0x39   :  { %397 = vmatpush3.bf16.msra.mxu0 %v444_v0  ;;  %428 = vmatpush3.bf16.msra.mxu1 %v444_v0  ;;  %v629_v5 = vld [vmem:[#allocation2 + $0x8] sm:$0xff]  ;;  %v631_v6 = vld [vmem:[#allocation2 + $0x20] sm:$0xff]  ;;  %v450_v12 = vld [vmem:[#allocation5 + $0x30] sm:$0xff]   ;;  %s534_s24 = scalar_lea.vmem %s361_s23, 1024  ;;  %p539_p11 = scmp.lt.s32.totalorder %s361_s23, %s361_s23 }
  0x3a   :  { %398 = vmatprep.subr.bf16.mxu0 %v445_v1  ;;  %421 = vmatprep.subr.bf16.mxu1 %v445_v1  ;;  %v63_v7 = vpack.c.bf16 %v629_v5, %v55_v4  ;;  %v634_v8 = vld [vmem:[#allocation2 + $0x28] sm:$0xff]  ;;  %v448_v10 = vld [vmem:[#allocation5 + $0x20] sm:$0xff]   ;;  %v451_v13 = vld [vmem:[#allocation5 + $0x38] sm:$0xff]   ;;  %p535_p10 = scmp.ne.s32.totalorder %s361_s23, %s534_s24  ;;  %p540_p12 = scmp.lt.s32.totalorder %s534_s24, %s534_s24 }
  0x3b   :  { %v65_v9 = vpack.c.bf16 %v634_v8, %v631_v6  ;;  %v449_v11 = vld [vmem:[#allocation5 + $0x28] sm:$0xff]   ;;  %v57_v14 = vld [vmem:[#allocation2 + $0x10] sm:$0xff]  ;;  %v58_v15 = vld [vmem:[#allocation2 + $0x18] sm:$0xff] }
  0x3c   :  { %412 = vmatprep.mubr.bf16.mxu0 %v63_v7  ;;  %v61_v16 = vld [vmem:[#allocation2 + $0x30] sm:$0xff]  ;;  %v62_v17 = vld [vmem:[#allocation2 + $0x38] sm:$0xff]  ;;  %v64_v18 = vpack.c.bf16 %v58_v15, %v57_v14  ;;  %v373_v20 = vld [vmem:[#allocation7] ss:$0 sm:$0xff]  ;;  %p541_p13 = por %p540_p12, %p539_p11 }
  0x3d   :  { %399 = vmatpush3.bf16.msra.mxu0 %v445_v1  ;;  %429 = vmatpush3.bf16.msra.mxu1 %v445_v1  ;;  %v66_v19 = vpack.c.bf16 %v62_v17, %v61_v16 }
  0x3e   :  { %400 = vmatprep.subr.bf16.mxu0 %v446_v2  ;;  %422 = vmatprep.subr.bf16.mxu1 %v446_v2  ;;  %p542_p0 = pnand %p541_p13, %p535_p10 }
  0x3f   :  { %416 = vmatprep.mubr.bf16.mxu1 %v65_v9 }
  0x41   :  { %401 = vmatpush3.bf16.msra.mxu0 %v446_v2  ;;  %430 = vmatpush3.bf16.msra.mxu1 %v446_v2 }
  0x42   :  { %402 = vmatprep.subr.bf16.mxu0 %v447_v3  ;;  %423 = vmatprep.subr.bf16.mxu1 %v447_v3 }
  0x45   :  { %403 = vmatpush3.bf16.msra.mxu0 %v447_v3  ;;  %431 = vmatpush3.bf16.msra.mxu1 %v447_v3 }
  0x46   :  { %404 = vmatprep.subr.bf16.mxu0 %v448_v10  ;;  %424 = vmatprep.subr.bf16.mxu1 %v448_v10 }
  0x49   :  { %405 = vmatpush3.bf16.msra.mxu0 %v448_v10  ;;  %432 = vmatpush3.bf16.msra.mxu1 %v448_v10 }
  0x4a   :  { %406 = vmatprep.subr.bf16.mxu0 %v449_v11  ;;  %425 = vmatprep.subr.bf16.mxu1 %v449_v11 }
  0x4d   :  { %407 = vmatpush3.bf16.msra.mxu0 %v449_v11  ;;  %433 = vmatpush3.bf16.msra.mxu1 %v449_v11 }
  0x4e   :  { %408 = vmatprep.subr.bf16.mxu0 %v450_v12  ;;  %426 = vmatprep.subr.bf16.mxu1 %v450_v12 }
  0x51   :  { %409 = vmatpush3.bf16.msra.mxu0 %v450_v12  ;;  %434 = vmatpush3.bf16.msra.mxu1 %v450_v12 }
  0x52   :  { %410 = vmatprep.subr.bf16.mxu0 %v451_v13  ;;  %427 = vmatprep.subr.bf16.mxu1 %v451_v13 }
  0x55   :  { %411 = vmatpush3.bf16.msra.mxu0 %v451_v13  ;;  %435 = vmatpush3.bf16.msra.mxu1 %v451_v13 }
  0x58   :  { %413 = vmatmul.mubr.bf16.vlgmr.msra.gmra.mrb[0].mxu0 %v64_v18  ;;  %417 = vmatmul.mubr.bf16.vlgmr.msra.gmra.mrb[0].mxu1 %v66_v19 }
 0x12b   :  { %v414_v21 = vpop.f32.mrb[0].mxu0  ;;  %v418_v22 = vpop.f32.mrb[0].mxu1 }
 0x12c   :  { %v179_v23 = vadd.f32 %v414_v21, %v373_v20  ;;  %v195_v24 = vadd.f32 %v418_v22, %v373_v20  ;;  %v170_v25 = vpop.f32.mrb[1].mxu0  ;;  %v186_v26 = vpop.f32.mrb[1].mxu1 }
 0x12d   :  { %v415_v27 = vpop.f32.mrb[2].mxu0  ;;  %v419_v28 = vpop.f32.mrb[2].mxu1  ;;  %v171_v31 = vadd.f32 %v373_v20, %v170_v25  ;;  %v187_v36 = vadd.f32 %v373_v20, %v186_v26 }
 0x12e   :  { %v638_v29 = vadd.f32 %v179_v23, %v57_v14  ;;  %v640_v30 = vadd.f32 %v195_v24, %v61_v16  ;;  %v182_v32 = vadd.f32 %v415_v27, %v373_v20  ;;  %v173_v33 = vpop.f32.mrb[3].mxu0  ;;  %v189_v34 = vpop.f32.mrb[3].mxu1  ;;  %v198_v38 = vadd.f32 %v419_v28, %v373_v20 }
 0x12f   :  { %v644_v35 = vadd.f32 %v171_v31, %v55_v4  ;;  %v651_v39 = vadd.f32 %v187_v36, %v631_v6  ;;  %v190_v41 = vadd.f32 %v373_v20, %v189_v34  ;;  %v174_v42 = vadd.f32 %v373_v20, %v173_v33 }
 0x130   :  { %221 = vadd.xlane.f32.xlu0 %v640_v30  ;;  %213 = vadd.xlane.f32.xlu1 %v638_v29  ;;  %v646_v37 = vadd.f32 %v182_v32, %v58_v15  ;;  %v653_v40 = vadd.f32 %v198_v38, %v62_v17  ;;  %v227_v44 = vmul.f32 %v638_v29, %v638_v29 }
 0x131   :  { %v658_v43 = vadd.f32 %v190_v41, %v634_v8  ;;  %v664_v45 = vadd.f32 %v174_v42, %v629_v5  ;;  %v225_v48 = vmul.f32 %v644_v35, %v644_v35  ;;  %v229_v50 = vmul.f32 %v651_v39, %v651_v39 }
 0x132   :  { %v228_v46 = vmul.f32 %v646_v37, %v646_v37  ;;  %v232_v51 = vmul.f32 %v653_v40, %v653_v40  ;;  %v231_v52 = vmul.f32 %v640_v30, %v640_v30 }
 0x133   :  { %v226_v47 = vmul.f32 %v664_v45, %v664_v45  ;;  %v230_v49 = vmul.f32 %v658_v43, %v658_v43 }
 0x134   :  { %215 = vadd.xlane.f32.xlu1 %v646_v37  ;;  %209 = vadd.xlane.f32.xlu0 %v644_v35 }
 0x138   :  { %223 = vadd.xlane.f32.xlu1 %v653_v40  ;;  %217 = vadd.xlane.f32.xlu0 %v651_v39 }
 0x13c   :  { %219 = vadd.xlane.f32.xlu1 %v658_v43  ;;  %237 = vadd.xlane.f32.xlu0 %v227_v44 }
 0x140   :  { %239 = vadd.xlane.f32.xlu1 %v228_v46  ;;  %211 = vadd.xlane.f32.xlu0 %v664_v45 }
 0x144   :  { %235 = vadd.xlane.f32.xlu1 %v226_v47  ;;  %233 = vadd.xlane.f32.xlu0 %v225_v48 }
 0x148   :  { %243 = vadd.xlane.f32.xlu1 %v230_v49  ;;  %241 = vadd.xlane.f32.xlu0 %v229_v50 }
 0x14c   :  { %247 = vadd.xlane.f32.xlu1 %v232_v51  ;;  %245 = vadd.xlane.f32.xlu0 %v231_v52 }
 0x1bd   :  { %v222_v53 = vpop.xlane.xlu0 %221  ;;  %v214_v54 = vpop.xlane.xlu1 %213 }
 0x1be   :  { %v251_v59 = vmul.f32 0.0078125, %v214_v54  ;;  %v697_v23 = vmul.f32 0.0078125, %v222_v53 }
 0x1c0   :  { %v267_v62 = vmul.f32 %v251_v59, %v251_v59  ;;  %v271_v42 = vmul.f32 %v697_v23, %v697_v23  ;;  %v307_v52 = vsub.f32 %v638_v29, %v251_v59 }
 0x1c1   :  { %v216_v55 = vpop.xlane.xlu1 %215  ;;  %v210_v56 = vpop.xlane.xlu0 %209 }
 0x1c2   :  { %v681_v63 = vmul.f32 0.0078125, %v216_v55  ;;  %v683_v2 = vmul.f32 0.0078125, %v210_v56  ;;  %v382_v55 = vld [vmem:[#allocation7 + $0x1] ss:$0 sm:$0xff] }
 0x1c4   :  { %v268_v5 = vmul.f32 %v681_v63, %v681_v63  ;;  %v265_v11 = vmul.f32 %v683_v2, %v683_v2 }
 0x1c5   :  { %v224_v57 = vpop.xlane.xlu1 %223  ;;  %v218_v58 = vpop.xlane.xlu0 %217 }
 0x1c6   :  { %v695_v19 = vmul.f32 0.0078125, %v218_v58  ;;  %v699_v24 = vmul.f32 0.0078125, %v224_v57 }
 0x1c8   :  { %v269_v33 = vmul.f32 %v695_v19, %v695_v19  ;;  %v272_v44 = vmul.f32 %v699_v24, %v699_v24 }
 0x1c9   :  { %v220_v60 = vpop.xlane.xlu1 %219  ;;  %v238_v61 = vpop.xlane.xlu0 %237 }
 0x1ca   :  { %v259_v0 = vmul.f32 0.0078125, %v238_v61  ;;  %v691_v12 = vmul.f32 0.0078125, %v220_v60 }
 0x1cc   :  { %v275_v1 = vsub.f32 %v259_v0, %v267_v62  ;;  %v270_v25 = vmul.f32 %v691_v12, %v691_v12  ;;  %v383_v62 = vld [vmem:[#allocation7 + $0x2] ss:$0 sm:$0xff] }
 0x1cd   :  { %v240_v3 = vpop.xlane.xlu1 %239  ;;  %v212_v4 = vpop.xlane.xlu0 %211 }
 0x1ce   :  { %v283_v6 = vmax.f32 %v275_v1, 0.0  ;;  %v260_v7 = vmul.f32 0.0078125, %v240_v3  ;;  %v687_v8 = vmul.f32 0.0078125, %v212_v4  ;;  %v308_v3 = vsub.f32 %v646_v37, %v681_v63 }
 0x1d0   :  { %v291_v9 = vadd.f32 1e-05, %v283_v6  ;;  %v276_v10 = vsub.f32 %v260_v7, %v268_v5  ;;  %v266_v13 = vmul.f32 %v687_v8, %v687_v8 }
 0x1d1   :  { %v236_v14 = vpop.xlane.xlu1 %235  ;;  %v234_v15 = vpop.xlane.xlu0 %233 }
 0x1d2   :  { %452 = vrsqrt.f32 %v291_v9  ;;  %v284_v16 = vmax.f32 %v276_v10, 0.0  ;;  %v258_v17 = vmul.f32 0.0078125, %v236_v14  ;;  %v257_v18 = vmul.f32 0.0078125, %v234_v15 }
 0x1d3   :  { %v306_v10 = vsub.f32 %v664_v45, %v687_v8 }
 0x1d4   :  { %v292_v20 = vadd.f32 1e-05, %v284_v16  ;;  %v274_v21 = vsub.f32 %v258_v17, %v266_v13  ;;  %v273_v22 = vsub.f32 %v257_v18, %v265_v11  ;;  %v305_v13 = vsub.f32 %v644_v35, %v683_v2 }
 0x1d5   :  { %v244_v26 = vpop.xlane.xlu1 %243  ;;  %v242_v27 = vpop.xlane.xlu0 %241  ;;  %v310_v16 = vsub.f32 %v658_v43, %v691_v12  ;;  %v312_v35 = vsub.f32 %v653_v40, %v699_v24  ;;  %v311_v43 = vsub.f32 %v640_v30, %v697_v23 }
 0x1d6   :  { %454 = vrsqrt.f32 %v292_v20  ;;  %v282_v28 = vmax.f32 %v274_v21, 0.0  ;;  %v281_v31 = vmax.f32 %v273_v22, 0.0  ;;  %v262_v32 = vmul.f32 0.0078125, %v244_v26 }
 0x1d7   :  { %v261_v34 = vmul.f32 0.0078125, %v242_v27  ;;  %v309_v20 = vsub.f32 %v651_v39, %v695_v19 }
 0x1d8   :  { %v290_v36 = vadd.f32 1e-05, %v282_v28  ;;  %v289_v38 = vadd.f32 1e-05, %v281_v31  ;;  %v278_v41 = vsub.f32 %v262_v32, %v270_v25 }
 0x1d9   :  { %v277_v46 = vsub.f32 %v261_v34, %v269_v33  ;;  %v248_v47 = vpop.xlane.xlu1 %247  ;;  %v246_v48 = vpop.xlane.xlu0 %245 }
 0x1da   :  { %456 = vrsqrt.f32 %v290_v36  ;;  %v286_v49 = vmax.f32 %v278_v41, 0.0  ;;  %v264_v50 = vmul.f32 0.0078125, %v248_v47  ;;  %v263_v51 = vmul.f32 0.0078125, %v246_v48 }
 0x1db   :  { %458 = vrsqrt.f32 %v289_v38  ;;  %v285_v53 = vmax.f32 %v277_v46, 0.0 }
 0x1dc   :  { %v453_v54 = vpop.eup %452  ;;  %v294_v56 = vadd.f32 1e-05, %v286_v49  ;;  %v280_v57 = vsub.f32 %v264_v50, %v272_v44  ;;  %v279_v58 = vsub.f32 %v263_v51, %v271_v42 }
 0x1dd   :  { %v315_v60 = vmul.f32 %v453_v54, %v307_v52  ;;  %v293_v61 = vadd.f32 1e-05, %v285_v53 }
 0x1de   :  { %460 = vrsqrt.f32 %v294_v56  ;;  %v288_v0 = vmax.f32 %v280_v57, 0.0  ;;  %v287_v1 = vmax.f32 %v279_v58, 0.0 }
 0x1df   :  { %v328_v4 = vmul.f32 %v382_v55, %v315_v60  ;;  %462 = vrsqrt.f32 %v293_v61 }
 0x1e0   :  { %v455_v5 = vpop.eup %454  ;;  %v296_v29 = vadd.f32 1e-05, %v288_v0  ;;  %v295_v59 = vadd.f32 1e-05, %v287_v1 }
 0x1e1   :  { %v341_v6 = vadd.f32 %v383_v62, %v328_v4  ;;  %v316_v7 = vmul.f32 %v455_v5, %v308_v3 }
 0x1e2   :  { %464 = vrsqrt.f32 %v296_v29 }
 0x1e3   :  { %349 = vst [vmem:[#allocation8 + $0x10] sm:$0xff] %v341_v6  ;;  %v329_v9 = vmul.f32 %v382_v55, %v316_v7  ;;  %466 = vrsqrt.f32 %v295_v59 }
 0x1e4   :  { %v457_v11 = vpop.eup %456 }
 0x1e5   :  { %v459_v14 = vpop.eup %458  ;;  %v342_v37 = vadd.f32 %v383_v62, %v329_v9  ;;  %v314_v63 = vmul.f32 %v457_v11, %v306_v10 }
 0x1e6   :  { %v313_v15 = vmul.f32 %v459_v14, %v305_v13 }
 0x1e7   :  { %350 = vst [vmem:[#allocation8 + $0x18] sm:$0xff] %v342_v37  ;;  %v327_v17 = vmul.f32 %v382_v55, %v314_v63 }
 0x1e8   :  { %v461_v18 = vpop.eup %460  ;;  %v326_v21 = vmul.f32 %v382_v55, %v313_v15 }
 0x1e9   :  { %v463_v45 = vpop.eup %462  ;;  %v340_v8 = vadd.f32 %v383_v62, %v327_v17  ;;  %v318_v22 = vmul.f32 %v461_v18, %v310_v16 }
 0x1ea   :  { %v339_v25 = vadd.f32 %v383_v62, %v326_v21  ;;  %v317_v26 = vmul.f32 %v463_v45, %v309_v20 }
 0x1eb   :  { %348 = vst [vmem:[#allocation8 + $0x8] sm:$0xff] %v340_v8  ;;  %v331_v2 = vmul.f32 %v382_v55, %v318_v22 }
 0x1ec   :  { %v465_v27 = vpop.eup %464  ;;  %347 = vst [vmem:[#allocation8] sm:$0xff] %v339_v25  ;;  %v330_v12 = vmul.f32 %v382_v55, %v317_v26 }
 0x1ed   :  { %v467_v28 = vpop.eup %466  ;;  %v344_v31 = vadd.f32 %v383_v62, %v331_v2  ;;  %v320_v39 = vmul.f32 %v465_v27, %v312_v35 }
 0x1ee   :  { %v343_v19 = vadd.f32 %v383_v62, %v330_v12  ;;  %v319_v32 = vmul.f32 %v467_v28, %v311_v43 }
 0x1ef   :  { %352 = vst [vmem:[#allocation8 + $0x28] sm:$0xff] %v344_v31  ;;  %v333_v33 = vmul.f32 %v382_v55, %v320_v39 }
 0x1f0   :  { %351 = vst [vmem:[#allocation8 + $0x20] sm:$0xff] %v343_v19  ;;  %v332_v34 = vmul.f32 %v382_v55, %v319_v32 }
 0x1f1   :  { %v346_v40 = vadd.f32 %v383_v62, %v333_v33 }
 0x1f2   :  { %v345_v24 = vadd.f32 %v383_v62, %v332_v34 }
 0x1f3   :  { %354 = vst [vmem:[#allocation8 + $0x38] sm:$0xff] %v346_v40 }
 0x1f4   :  { %353 = vst [vmem:[#allocation8 + $0x30] sm:$0xff] %v345_v24 }
 0x1f5   :  { %545 = shalt.err (!%p542_p0)
}
 0x1f6   :  { %s546_s27 = scalar_lea.hbm %s742_s3, 1024 }
 0x1f7   :  { %p547_p1 = scmp.ne.s32.totalorder %s742_s3, %s546_s27  ;;  %p550_p2 = scmp.lt.u32.totalorder %s546_s27, %s742_s3 }
 0x1f9   :  { %p552_p3 = pnand %p550_p2, %p547_p1 }
 0x1fb   :  { %555 = shalt.err (!%p552_p3)
}
 0x1fc   :  { %366 = dma.vmem_to_hbm [thread:$0]  %s361_s23, 1024, %s742_s3, [#allocation4], %s566_s1, %s566_s1, %s567_s9  }
 0x1fd   :  { %560 = dma.done.wait [#allocation4], 1024  }
 0x1fe   :  { %561 = vsyncadd [#allocation4], 4294966272 }
 0x1ff   :  { %370 = vsyncpa [#allocation3], 1 }
 0x200   :  { %371 = vsyncpa [#allocation6], 1 }
 0x201   :  { %372 = vsyncpa [#allocation4], 1 }

</bundles_post_ra>
